<compile_context>
chip_gen: v7x
topology: tpu7x:2x2x1
jax: 0.10.0
libtpu: 0.0.40
codegen_flags: <defaults>
</compile_context>

<pallas_src>
import functools

import jax
import jax.numpy as jnp
from jax.experimental import pallas as pl
from jax.experimental.pallas import tpu as pltpu

LANE = 128  # pad feature dims (Cout, num_classes) to the lane width


# ---------------------------------------------------------------------------
# Fused kernel
# ---------------------------------------------------------------------------
def _fused_cnn_kernel(x_ref, w1_ref, b1_ref, w2_ref, b2_ref, o_ref, pool_acc,
                      *, row_tile, width, hw):
    """conv3x3+bias+ReLU on one row tile, accumulate pooled sum, head at end.

    x_ref   : (1, 1, row_tile+2, W+2, Cin)  bf16  input rows with 1-row halo
    w1_ref  : (9, Cin, LANE)                bf16  conv weight, tap-major
    b1_ref  : (1, LANE)                     f32   conv bias (zero padded)
    w2_ref  : (LANE, LANE)                  f32   head weight (zero padded)
    b2_ref  : (1, LANE)                     f32   head bias (zero padded)
    o_ref   : (1, 1, LANE)                  f32   per-image padded logits
    pool_acc: (1, LANE)                     f32   running sum over H*W
    """
    j = pl.program_id(1)

    @pl.when(j == 0)
    def _init():
        pool_acc[...] = jnp.zeros_like(pool_acc)

    x = x_ref[0, 0]                                  # (row_tile+2, W+2, Cin)
    cin = x.shape[-1]

    # 3x3 conv on this row tile as 9 shifted (rows*W, Cin) x (Cin, LANE)
    # MXU matmuls accumulated in f32 (no im2col materialization).
    acc = jnp.zeros((row_tile * width, LANE), jnp.float32)
    for tap in range(9):
        dh, dw = tap // 3, tap % 3
        xs = x[dh:dh + row_tile, dw:dw + width, :].reshape(row_tile * width, cin)
        acc = acc + jnp.dot(xs, w1_ref[tap], preferred_element_type=jnp.float32)

    relu = jnp.maximum(acc + b1_ref[...], 0.0)       # (row_tile*W, LANE) f32

    # Partial global-average-pool: fold this tile's rows into the accumulator.
    pool_acc[...] += jnp.sum(relu, axis=0, keepdims=True)

    @pl.when(j == pl.num_programs(1) - 1)
    def _epilogue():
        pooled = pool_acc[...] * (1.0 / hw)          # (1, LANE) mean over H*W
        logits = (
            jnp.dot(pooled, w2_ref[...], preferred_element_type=jnp.float32)
            + b2_ref[...]
        )                                            # (1, LANE), lane-dense
        o_ref[...] = logits.reshape(1, 1, LANE)


# ---------------------------------------------------------------------------
# Host wrapper
# ---------------------------------------------------------------------------
def cnn_forward(x, params, *, row_tile=8):
    """x: (N, Cin, H, W) f32 NCHW -> (N, num_classes) f32 logits."""
    n, cin, h, w = x.shape
    w_conv, b_conv, w_fc, b_fc = params              # PyTorch-style layouts
    cout = w_conv.shape[0]
    num_classes = w_fc.shape[0]

    if h % row_tile != 0:                            # fall back: 1 tile/image
        row_tile = h
    ht = h // row_tile

    # --- cheap host-side layout plumbing (no 9x im2col blow-up) ------------
    # NCHW -> NHWC, zero-pad spatial dims by 1 (conv padding=1), split into
    # row tiles carrying a 2-row halo; patches are built inside the kernel.
    x_nhwc = jnp.transpose(x, (0, 2, 3, 1))                       # (N,H,W,C)
    xp = jnp.pad(x_nhwc, ((0, 0), (1, 1), (1, 1), (0, 0)))
    tiles = jnp.stack(
        [xp[:, j * row_tile:j * row_tile + row_tile + 2] for j in range(ht)],
        axis=1,
    ).astype(jnp.bfloat16)                    # (N, HT, row_tile+2, W+2, Cin)

    # Conv weight (Cout, Cin, 3, 3) -> tap-major (9, Cin, LANE) bf16,
    # zero-padded to 128 output columns for dense lanes / MXU utilization.
    w1 = jnp.transpose(w_conv, (2, 3, 1, 0)).reshape(9, cin, cout)
    w1 = jnp.pad(w1, ((0, 0), (0, 0), (0, LANE - cout))).astype(jnp.bfloat16)
    b1 = jnp.pad(b_conv, (0, LANE - cout)).reshape(1, LANE).astype(jnp.float32)

    # Head: PyTorch Linear weight (num_classes, Cout) -> (LANE, LANE) f32.
    w2 = jnp.pad(w_fc.T, ((0, LANE - cout), (0, LANE - num_classes)))
    w2 = w2.astype(jnp.float32)
    b2 = jnp.pad(b_fc, (0, LANE - num_classes)).reshape(1, LANE)
    b2 = b2.astype(jnp.float32)

    kernel = functools.partial(
        _fused_cnn_kernel, row_tile=row_tile, width=w, hw=h * w)

    flops = 2 * n * h * w * (9 * cin) * cout + 2 * n * cout * num_classes
    bytes_accessed = (
        tiles.size * 2 + w1.size * 2
        + (b1.size + w2.size + b2.size + n * LANE) * 4)

    out = pl.pallas_call(
        kernel,
        out_shape=jax.ShapeDtypeStruct((n, 1, LANE), jnp.float32),
        grid=(n, ht),
        in_specs=[
            pl.BlockSpec((1, 1, row_tile + 2, w + 2, cin),
                         lambda i, j: (i, j, 0, 0, 0)),
            pl.BlockSpec((9, cin, LANE), lambda i, j: (0, 0, 0)),
            pl.BlockSpec((1, LANE), lambda i, j: (0, 0)),
            pl.BlockSpec((LANE, LANE), lambda i, j: (0, 0)),
            pl.BlockSpec((1, LANE), lambda i, j: (0, 0)),
        ],
        out_specs=pl.BlockSpec((1, 1, LANE), lambda i, j: (i, 0, 0)),
        scratch_shapes=[pltpu.VMEM((1, LANE), jnp.float32)],
        compiler_params=pltpu.CompilerParams(
            dimension_semantics=("parallel", "arbitrary"),
            vmem_limit_bytes=32 * 1024 * 1024,
        ),
        cost_estimate=pl.CostEstimate(
            flops=flops, transcendentals=0, bytes_accessed=bytes_accessed),
    )(tiles, w1, b1, w2, b2)

    return out[:, 0, :num_classes]


# ---------------------------------------------------------------------------
# Parameters (PyTorch-style layouts) and pure-JAX reference for checking.
# ---------------------------------------------------------------------------
def init_params(key, cin=3, cout=16, num_classes=4):
    k1, k2, k3, k4 = jax.random.split(key, 4)
    w_conv = jax.random.normal(k1, (cout, cin, 3, 3), jnp.float32) * 0.1
    b_conv = jax.random.normal(k2, (cout,), jnp.float32) * 0.01
    w_fc = jax.random.normal(k3, (num_classes, cout), jnp.float32) * 0.1
    b_fc = jax.random.normal(k4, (num_classes,), jnp.float32) * 0.01
    return (w_conv, b_conv, w_fc, b_fc)


def _reference_forward(x, params):
    w_conv, b_conv, w_fc, b_fc = params
    # Match the kernel's bf16 input/weight rounding; accumulate in f32.
    xb = x.astype(jnp.bfloat16).astype(jnp.float32)
    wb = w_conv.astype(jnp.bfloat16).astype(jnp.float32)
    y = jax.lax.conv_general_dilated(
        xb, wb, window_strides=(1, 1), padding=((1, 1), (1, 1)),
        dimension_numbers=("NCHW", "OIHW", "NCHW"),
        precision=jax.lax.Precision.HIGHEST)
    y = jnp.maximum(y + b_conv[None, :, None, None], 0.0)
    pooled = y.mean(axis=(2, 3))
    return jnp.dot(pooled, w_fc.T, precision=jax.lax.Precision.HIGHEST) + b_fc


if __name__ == "__main__":
    key = jax.random.PRNGKey(0)
    kx, kp = jax.random.split(key)

    num_classes = 4
    # colormode='rgb' -> 3 input channels; NCHW like PyTorch.
    x = jax.random.normal(kx, (2, 3, 16, 16), jnp.float32)
    params = init_params(kp, cin=3, cout=16, num_classes=num_classes)

    logits = jax.jit(cnn_forward)(x, params)
    jax.block_until_ready(logits)
    assert logits.shape == (2, num_classes)

    ref = _reference_forward(x, params)
    assert bool(jnp.allclose(logits, ref, atol=2e-2, rtol=2e-2)), (
        "Pallas kernel disagrees with the pure-JAX reference")

    print("KERNEL_OK")
</pallas_src>

<mosaic_0001>
module attributes {stable_mosaic.version = 11 : i64} {
  func.func @_fused_cnn_kernel(%arg0: i32, %arg1: i32, %arg2: memref<1x1x10x18x3xbf16, #tpu.memory_space<vmem>>, %arg3: memref<9x3x128xbf16, #tpu.memory_space<vmem>>, %arg4: memref<1x128xf32, #tpu.memory_space<vmem>>, %arg5: memref<128x128xf32, #tpu.memory_space<vmem>>, %arg6: memref<1x128xf32, #tpu.memory_space<vmem>>, %arg7: memref<1x1x128xf32, #tpu.memory_space<vmem>>, %arg8: memref<1x128xf32, #tpu.memory_space<vmem>>) attributes {dimension_semantics = [#tpu.dimension_semantics<parallel>, #tpu.dimension_semantics<arbitrary>], iteration_bounds = array<i64: 2, 2>, scalar_prefetch = 0 : i64, scratch_operands = 1 : i64, tpu.core_type = #tpu.core_type<tc>, window_params = [{transform_indices = @transform_0, window_bounds = array<i64: 1, 1, 10, 18, 3>}, {pipeline_mode = #tpu.pipeline_mode<synchronous>, transform_indices = @transform_1, window_bounds = array<i64: 9, 3, 128>}, {pipeline_mode = #tpu.pipeline_mode<synchronous>, transform_indices = @transform_2, window_bounds = array<i64: 1, 128>}, {pipeline_mode = #tpu.pipeline_mode<synchronous>, transform_indices = @transform_3, window_bounds = array<i64: 128, 128>}, {pipeline_mode = #tpu.pipeline_mode<synchronous>, transform_indices = @transform_4, window_bounds = array<i64: 1, 128>}, {transform_indices = @transform_5, window_bounds = array<i64: 1, 1, 128>}]} {
    %c0_i32 = arith.constant 0 : i32
    %0 = arith.cmpi eq, %arg1, %c0_i32 : i32
    %1 = arith.extui %0 : i1 to i32
    %c0_i32_0 = arith.constant 0 : i32
    %2 = arith.cmpi ne, %1, %c0_i32_0 : i32
    scf.if %2 {
      %cst_42 = arith.constant 0.000000e+00 : f32
      %73 = vector.broadcast %cst_42 : f32 to vector<1x128xf32>
      %c0_43 = arith.constant 0 : index
      %c0_44 = arith.constant 0 : index
      %74 = vector.load %arg8[%c0_43, %c0_44] : memref<1x128xf32, #tpu.memory_space<vmem>>, vector<1x128xf32>
      tpu.vector_store %arg8[%c0_43, %c0_44], %73 {strides = array<i32>} : memref<1x128xf32, #tpu.memory_space<vmem>>, vector<1x128xf32>,
    } else {
    }
    %c0 = arith.constant 0 : index
    %c0_1 = arith.constant 0 : index
    %c0_2 = arith.constant 0 : index
    %c0_3 = arith.constant 0 : index
    %c0_4 = arith.constant 0 : index
    %3 = vector.load %arg2[%c0, %c0_1, %c0_2, %c0_3, %c0_4] : memref<1x1x10x18x3xbf16, #tpu.memory_space<vmem>>, vector<1x1x10x18x3xbf16>
    %4 = vector.shape_cast %3 : vector<1x1x10x18x3xbf16> to vector<10x18x3xbf16>
    %cst = arith.constant 0.000000e+00 : f32
    %5 = vector.broadcast %cst : f32 to vector<128x128xf32>
    %6 = vector.extract_strided_slice %4 {offsets = [0, 0, 0], sizes = [8, 16, 3], strides = [1, 1, 1]} : vector<10x18x3xbf16> to vector<8x16x3xbf16>
    %7 = vector.shape_cast %6 : vector<8x16x3xbf16> to vector<128x3xbf16>
    %c0_5 = arith.constant 0 : index
    %c0_6 = arith.constant 0 : index
    %c0_7 = arith.constant 0 : index
    %8 = vector.load %arg3[%c0_5, %c0_6, %c0_7] : memref<9x3x128xbf16, #tpu.memory_space<vmem>>, vector<1x3x128xbf16>
    %9 = vector.shape_cast %8 : vector<1x3x128xbf16> to vector<3x128xbf16>
    %cst_8 = arith.constant dense<0.000000e+00> : vector<128x128xf32>
    %10 = tpu.matmul %7, %9, %cst_8 {dimension_numbers = #tpu.dot_dimension_numbers<[1], [0], [0], [1], [0, 0, 1, 1], [], []>} : vector<128x3xbf16>, vector<3x128xbf16>, vector<128x128xf32> -> vector<128x128xf32>
    %11 = arith.addf %5, %10 : vector<128x128xf32>
    %12 = vector.extract_strided_slice %4 {offsets = [0, 1, 0], sizes = [8, 16, 3], strides = [1, 1, 1]} : vector<10x18x3xbf16> to vector<8x16x3xbf16>
    %13 = vector.shape_cast %12 : vector<8x16x3xbf16> to vector<128x3xbf16>
    %c1 = arith.constant 1 : index
    %c0_9 = arith.constant 0 : index
    %c0_10 = arith.constant 0 : index
    %14 = vector.load %arg3[%c1, %c0_9, %c0_10] : memref<9x3x128xbf16, #tpu.memory_space<vmem>>, vector<1x3x128xbf16>
    %15 = vector.shape_cast %14 : vector<1x3x128xbf16> to vector<3x128xbf16>
    %cst_11 = arith.constant dense<0.000000e+00> : vector<128x128xf32>
    %16 = tpu.matmul %13, %15, %cst_11 {dimension_numbers = #tpu.dot_dimension_numbers<[1], [0], [0], [1], [0, 0, 1, 1], [], []>} : vector<128x3xbf16>, vector<3x128xbf16>, vector<128x128xf32> -> vector<128x128xf32>
    %17 = arith.addf %11, %16 : vector<128x128xf32>
    %18 = vector.extract_strided_slice %4 {offsets = [0, 2, 0], sizes = [8, 16, 3], strides = [1, 1, 1]} : vector<10x18x3xbf16> to vector<8x16x3xbf16>
    %19 = vector.shape_cast %18 : vector<8x16x3xbf16> to vector<128x3xbf16>
    %c2 = arith.constant 2 : index
    %c0_12 = arith.constant 0 : index
    %c0_13 = arith.constant 0 : index
    %20 = vector.load %arg3[%c2, %c0_12, %c0_13] : memref<9x3x128xbf16, #tpu.memory_space<vmem>>, vector<1x3x128xbf16>
    %21 = vector.shape_cast %20 : vector<1x3x128xbf16> to vector<3x128xbf16>
    %cst_14 = arith.constant dense<0.000000e+00> : vector<128x128xf32>
    %22 = tpu.matmul %19, %21, %cst_14 {dimension_numbers = #tpu.dot_dimension_numbers<[1], [0], [0], [1], [0, 0, 1, 1], [], []>} : vector<128x3xbf16>, vector<3x128xbf16>, vector<128x128xf32> -> vector<128x128xf32>
    %23 = arith.addf %17, %22 : vector<128x128xf32>
    %24 = vector.extract_strided_slice %4 {offsets = [1, 0, 0], sizes = [8, 16, 3], strides = [1, 1, 1]} : vector<10x18x3xbf16> to vector<8x16x3xbf16>
    %25 = vector.shape_cast %24 : vector<8x16x3xbf16> to vector<128x3xbf16>
    %c3 = arith.constant 3 : index
    %c0_15 = arith.constant 0 : index
    %c0_16 = arith.constant 0 : index
    %26 = vector.load %arg3[%c3, %c0_15, %c0_16] : memref<9x3x128xbf16, #tpu.memory_space<vmem>>, vector<1x3x128xbf16>
    %27 = vector.shape_cast %26 : vector<1x3x128xbf16> to vector<3x128xbf16>
    %cst_17 = arith.constant dense<0.000000e+00> : vector<128x128xf32>
    %28 = tpu.matmul %25, %27, %cst_17 {dimension_numbers = #tpu.dot_dimension_numbers<[1], [0], [0], [1], [0, 0, 1, 1], [], []>} : vector<128x3xbf16>, vector<3x128xbf16>, vector<128x128xf32> -> vector<128x128xf32>
    %29 = arith.addf %23, %28 : vector<128x128xf32>
    %30 = vector.extract_strided_slice %4 {offsets = [1, 1, 0], sizes = [8, 16, 3], strides = [1, 1, 1]} : vector<10x18x3xbf16> to vector<8x16x3xbf16>
    %31 = vector.shape_cast %30 : vector<8x16x3xbf16> to vector<128x3xbf16>
    %c4 = arith.constant 4 : index
    %c0_18 = arith.constant 0 : index
    %c0_19 = arith.constant 0 : index
    %32 = vector.load %arg3[%c4, %c0_18, %c0_19] : memref<9x3x128xbf16, #tpu.memory_space<vmem>>, vector<1x3x128xbf16>
    %33 = vector.shape_cast %32 : vector<1x3x128xbf16> to vector<3x128xbf16>
    %cst_20 = arith.constant dense<0.000000e+00> : vector<128x128xf32>
    %34 = tpu.matmul %31, %33, %cst_20 {dimension_numbers = #tpu.dot_dimension_numbers<[1], [0], [0], [1], [0, 0, 1, 1], [], []>} : vector<128x3xbf16>, vector<3x128xbf16>, vector<128x128xf32> -> vector<128x128xf32>
    %35 = arith.addf %29, %34 : vector<128x128xf32>
    %36 = vector.extract_strided_slice %4 {offsets = [1, 2, 0], sizes = [8, 16, 3], strides = [1, 1, 1]} : vector<10x18x3xbf16> to vector<8x16x3xbf16>
    %37 = vector.shape_cast %36 : vector<8x16x3xbf16> to vector<128x3xbf16>
    %c5 = arith.constant 5 : index
    %c0_21 = arith.constant 0 : index
    %c0_22 = arith.constant 0 : index
    %38 = vector.load %arg3[%c5, %c0_21, %c0_22] : memref<9x3x128xbf16, #tpu.memory_space<vmem>>, vector<1x3x128xbf16>
    %39 = vector.shape_cast %38 : vector<1x3x128xbf16> to vector<3x128xbf16>
    %cst_23 = arith.constant dense<0.000000e+00> : vector<128x128xf32>
    %40 = tpu.matmul %37, %39, %cst_23 {dimension_numbers = #tpu.dot_dimension_numbers<[1], [0], [0], [1], [0, 0, 1, 1], [], []>} : vector<128x3xbf16>, vector<3x128xbf16>, vector<128x128xf32> -> vector<128x128xf32>
    %41 = arith.addf %35, %40 : vector<128x128xf32>
    %42 = vector.extract_strided_slice %4 {offsets = [2, 0, 0], sizes = [8, 16, 3], strides = [1, 1, 1]} : vector<10x18x3xbf16> to vector<8x16x3xbf16>
    %43 = vector.shape_cast %42 : vector<8x16x3xbf16> to vector<128x3xbf16>
    %c6 = arith.constant 6 : index
    %c0_24 = arith.constant 0 : index
    %c0_25 = arith.constant 0 : index
    %44 = vector.load %arg3[%c6, %c0_24, %c0_25] : memref<9x3x128xbf16, #tpu.memory_space<vmem>>, vector<1x3x128xbf16>
    %45 = vector.shape_cast %44 : vector<1x3x128xbf16> to vector<3x128xbf16>
    %cst_26 = arith.constant dense<0.000000e+00> : vector<128x128xf32>
    %46 = tpu.matmul %43, %45, %cst_26 {dimension_numbers = #tpu.dot_dimension_numbers<[1], [0], [0], [1], [0, 0, 1, 1], [], []>} : vector<128x3xbf16>, vector<3x128xbf16>, vector<128x128xf32> -> vector<128x128xf32>
    %47 = arith.addf %41, %46 : vector<128x128xf32>
    %48 = vector.extract_strided_slice %4 {offsets = [2, 1, 0], sizes = [8, 16, 3], strides = [1, 1, 1]} : vector<10x18x3xbf16> to vector<8x16x3xbf16>
    %49 = vector.shape_cast %48 : vector<8x16x3xbf16> to vector<128x3xbf16>
    %c7 = arith.constant 7 : index
    %c0_27 = arith.constant 0 : index
    %c0_28 = arith.constant 0 : index
    %50 = vector.load %arg3[%c7, %c0_27, %c0_28] : memref<9x3x128xbf16, #tpu.memory_space<vmem>>, vector<1x3x128xbf16>
    %51 = vector.shape_cast %50 : vector<1x3x128xbf16> to vector<3x128xbf16>
    %cst_29 = arith.constant dense<0.000000e+00> : vector<128x128xf32>
    %52 = tpu.matmul %49, %51, %cst_29 {dimension_numbers = #tpu.dot_dimension_numbers<[1], [0], [0], [1], [0, 0, 1, 1], [], []>} : vector<128x3xbf16>, vector<3x128xbf16>, vector<128x128xf32> -> vector<128x128xf32>
    %53 = arith.addf %47, %52 : vector<128x128xf32>
    %54 = vector.extract_strided_slice %4 {offsets = [2, 2, 0], sizes = [8, 16, 3], strides = [1, 1, 1]} : vector<10x18x3xbf16> to vector<8x16x3xbf16>
    %55 = vector.shape_cast %54 : vector<8x16x3xbf16> to vector<128x3xbf16>
    %c8 = arith.constant 8 : index
    %c0_30 = arith.constant 0 : index
    %c0_31 = arith.constant 0 : index
    %56 = vector.load %arg3[%c8, %c0_30, %c0_31] : memref<9x3x128xbf16, #tpu.memory_space<vmem>>, vector<1x3x128xbf16>
    %57 = vector.shape_cast %56 : vector<1x3x128xbf16> to vector<3x128xbf16>
    %cst_32 = arith.constant dense<0.000000e+00> : vector<128x128xf32>
    %58 = tpu.matmul %55, %57, %cst_32 {dimension_numbers = #tpu.dot_dimension_numbers<[1], [0], [0], [1], [0, 0, 1, 1], [], []>} : vector<128x3xbf16>, vector<3x128xbf16>, vector<128x128xf32> -> vector<128x128xf32>
    %59 = arith.addf %53, %58 : vector<128x128xf32>
    %c0_33 = arith.constant 0 : index
    %c0_34 = arith.constant 0 : index
    %60 = vector.load %arg4[%c0_33, %c0_34] : memref<1x128xf32, #tpu.memory_space<vmem>>, vector<1x128xf32>
    %61 = vector.broadcast %60 : vector<1x128xf32> to vector<128x128xf32>
    %62 = arith.addf %59, %61 : vector<128x128xf32>
    %cst_35 = arith.constant 0.000000e+00 : f32
    %63 = vector.broadcast %cst_35 : f32 to vector<128x128xf32>
    %64 = arith.maximumf %62, %63 : vector<128x128xf32>
    %c0_36 = arith.constant 0 : index
    %c0_37 = arith.constant 0 : index
    %65 = vector.load %arg8[%c0_36, %c0_37] : memref<1x128xf32, #tpu.memory_space<vmem>>, vector<1x128xf32>
    %cst_38 = arith.constant dense<0.000000e+00> : vector<128xf32>
    %66 = vector.multi_reduction <add>, %64, %cst_38 [0] : vector<128x128xf32> to vector<128xf32>
    %67 = vector.shape_cast %66 : vector<128xf32> to vector<1x128xf32>
    %68 = arith.addf %65, %67 : vector<1x128xf32>
    %c0_39 = arith.constant 0 : index
    %c0_40 = arith.constant 0 : index
    %69 = vector.load %arg8[%c0_39, %c0_40] : memref<1x128xf32, #tpu.memory_space<vmem>>, vector<1x128xf32>
    tpu.vector_store %arg8[%c0_39, %c0_40], %68 {strides = array<i32>} : memref<1x128xf32, #tpu.memory_space<vmem>>, vector<1x128xf32>,
    %c1_i32 = arith.constant 1 : i32
    %70 = arith.cmpi eq, %arg1, %c1_i32 : i32
    %71 = arith.extui %70 : i1 to i32
    %c0_i32_41 = arith.constant 0 : i32
    %72 = arith.cmpi ne, %71, %c0_i32_41 : i32
    scf.if %72 {
      %c0_42 = arith.constant 0 : index
      %c0_43 = arith.constant 0 : index
      %73 = vector.load %arg8[%c0_42, %c0_43] : memref<1x128xf32, #tpu.memory_space<vmem>>, vector<1x128xf32>
      %cst_44 = arith.constant 3.906250e-03 : f32
      %74 = vector.broadcast %cst_44 : f32 to vector<1x128xf32>
      %75 = arith.mulf %73, %74 : vector<1x128xf32>
      %c0_45 = arith.constant 0 : index
      %c0_46 = arith.constant 0 : index
      %76 = vector.load %arg5[%c0_45, %c0_46] : memref<128x128xf32, #tpu.memory_space<vmem>>, vector<128x128xf32>
      %cst_47 = arith.constant dense<0.000000e+00> : vector<1x128xf32>
      %77 = tpu.matmul %75, %76, %cst_47 {dimension_numbers = #tpu.dot_dimension_numbers<[1], [0], [0], [1], [0, 0, 1, 1], [], []>} : vector<1x128xf32>, vector<128x128xf32>, vector<1x128xf32> -> vector<1x128xf32>
      %c0_48 = arith.constant 0 : index
      %c0_49 = arith.constant 0 : index
      %78 = vector.load %arg6[%c0_48, %c0_49] : memref<1x128xf32, #tpu.memory_space<vmem>>, vector<1x128xf32>
      %79 = arith.addf %77, %78 : vector<1x128xf32>
      %80 = vector.shape_cast %79 : vector<1x128xf32> to vector<1x1x128xf32>
      %c0_50 = arith.constant 0 : index
      %c0_51 = arith.constant 0 : index
      %c0_52 = arith.constant 0 : index
      %81 = vector.load %arg7[%c0_50, %c0_51, %c0_52] : memref<1x1x128xf32, #tpu.memory_space<vmem>>, vector<1x1x128xf32>
      tpu.vector_store %arg7[%c0_50, %c0_51, %c0_52], %80 {strides = array<i32>} : memref<1x1x128xf32, #tpu.memory_space<vmem>>, vector<1x1x128xf32>,
    } else {
    }
    return
  }
  func.func @transform_0(%arg0: i32, %arg1: i32) -> (i32, i32, i32, i32, i32) {
    %c0_i32 = arith.constant 0 : i32
    %c0_i32_0 = arith.constant 0 : i32
    %c0_i32_1 = arith.constant 0 : i32
    %c0_i32_2 = arith.constant 0 : i32
    return %arg0, %arg1, %c0_i32, %c0_i32_0, %c0_i32_1 : i32, i32, i32, i32, i32
  }
  func.func @transform_1(%arg0: i32, %arg1: i32) -> (i32, i32, i32) {
    %c0_i32 = arith.constant 0 : i32
    %c0_i32_0 = arith.constant 0 : i32
    %c0_i32_1 = arith.constant 0 : i32
    %c0_i32_2 = arith.constant 0 : i32
    return %c0_i32, %c0_i32_0, %c0_i32_1 : i32, i32, i32
  }
  func.func @transform_2(%arg0: i32, %arg1: i32) -> (i32, i32) {
    %c0_i32 = arith.constant 0 : i32
    %c0_i32_0 = arith.constant 0 : i32
    %c0_i32_1 = arith.constant 0 : i32
    return %c0_i32, %c0_i32_0 : i32, i32
  }
  func.func @transform_3(%arg0: i32, %arg1: i32) -> (i32, i32) {
    %c0_i32 = arith.constant 0 : i32
    %c0_i32_0 = arith.constant 0 : i32
    %c0_i32_1 = arith.constant 0 : i32
    return %c0_i32, %c0_i32_0 : i32, i32
  }
  func.func @transform_4(%arg0: i32, %arg1: i32) -> (i32, i32) {
    %c0_i32 = arith.constant 0 : i32
    %c0_i32_0 = arith.constant 0 : i32
    %c0_i32_1 = arith.constant 0 : i32
    return %c0_i32, %c0_i32_0 : i32, i32
  }
  func.func @transform_5(%arg0: i32, %arg1: i32) -> (i32, i32, i32) {
    %c0_i32 = arith.constant 0 : i32
    %c0_i32_0 = arith.constant 0 : i32
    %c0_i32_1 = arith.constant 0 : i32
    return %arg0, %c0_i32, %c0_i32_0 : i32, i32, i32
  }
}

</mosaic_0001>

<bundles_post_ra>
// kernel: cnn_forward.1
= control target key start
LH: loop header
LB: loop body
LE: loop exit
PB: predicated region body
PF: predicated region fallthrough
CT: control target
= control target key end

     0   :  { %10 = vsyncpa [#allocation4], 0  ;;  %s3621_s0 = inlined_call_operand.vmem [shape: bf16[2,2,10,18,3], index: 0, kind: input, shape index: {}]   ;;  %s3622_s1 = inlined_call_operand.vmem [shape: bf16[9,3,128], index: 1, kind: input, shape index: {}]   ;;  %s3623_s2 = inlined_call_operand.vmem [shape: f32[1,128], index: 2, kind: input, shape index: {}]   ;;  %s3624_s3 = inlined_call_operand.vmem [shape: f32[128,128], index: 3, kind: input, shape index: {}]   ;;  %s3625_s4 = inlined_call_operand.vmem [shape: f32[1,128], index: 4, kind: input, shape index: {}]   ;;  %s3626_s5 = inlined_call_operand.hbm [shape: f32[2,1,128], index: 5, kind: output, shape index: {}]  }
   0x1   :  { %12 = vsyncpa [#allocation4 + $0x1], 0  ;;  %s2890_s18 = smov 0   ;;  %s2892_s19 = smov 0  }
   0x2   :  { %s2894_s20 = smov 0   ;;  %s2896_s21 = smov 0  }
   0x3   :  { %s2898_s22 = smov 0   ;;  %s2900_s23 = smov 0  }
   0x4   :  { %s2902_s24 = smov 0   ;;  %s2904_s25 = smov 0  }
   0x5 LB: > { %s2089_s26 = sadd.s32 4294967295, %s2852_s25   ;;  %s2090_s27 = sadd.s32 4294967294, %s2852_s25   ;;  %s2852_s25 = sphi %s2904_s25, %s18_s25   ;;  %s2848_s24 = sphi %s2902_s24, %s3642_s24   ;;  %s2844_s23 = sphi %s2900_s23, %s3641_s23   ;;  %s2840_s22 = sphi %s2898_s22, %s3640_s22   ;;  %s2836_s21 = sphi %s2896_s21, %s3639_s21   ;;  %s2832_s20 = sphi %s2894_s20, %s3638_s20   ;;  %s2828_s19 = sphi %s2892_s19, %s3637_s19   ;;  %s2824_s18 = sphi %s2890_s18, %s3636_s18  }
   0x6   : > { %s27_s28 = sadd.s32 1, %s2844_s23  ;;  %s30_s29 = sadd.s32 1, %s2848_s24 }
   0x7   : > { %p28_p0 = scmp.ge.s32.totalorder %s27_s28, 2  ;;  %p159_p1 = scmp.ne.s32.totalorder %s2832_s20, %s2828_s19 }
   0x8   : > { %p160_p2 = scmp.eq.s32.totalorder %s2089_s26, 3  ;;  %p165_p4 = scmp.ne.s32.totalorder %s2828_s19, %s2824_s18 }
   0x9   : > { %s3644_s28 = smov (%p28_p0, %s27_s28), 0  ;;  %s3646_s29 = smov (!%p28_p0, %s30_s29), %s2848_s24 }
   0xa   : > { %p2939_p3 = por %p160_p2, %p159_p1  ;;  %p32_p5 = scmp.ge.s32.totalorder %s3646_s29, 2 }
   0xb   : > { %p166_p6 = scmp.eq.s32.totalorder %s2090_s27, 3  ;;  %p2093_p7 = scmp.ge.s32.totalorder %s2852_s25, 1 }
   0xc   : > { %p208_p8 = scmp.lt.s32.totalorder %s2852_s25, 5  ;;  %s3648_s29 = smov (%p32_p5, %s3646_s29), 0 }
   0xd   : > { %3629 = sst [smem:[#allocation6_spill]] %s3648_s29  ;;  %p2949_p9 = por %p166_p6, %p165_p4 }
   0xe   : > { %p209_p10 = pnand %p2093_p7, %p208_p8  ;;  %s146_s7 = ssub.s32 %s2848_s24, %s3648_s29 }
   0xf   : > { %s149_s8 = sadd.s32 1, %s2832_s20  ;;  %p147_p11 = scmp.eq.s32.totalorder %s146_s7, 0 }
  0x10   : > { %212 = sbr.rel (%p209_p10) target bundleno = 686 (0x2ae), region = 40  ;;  %s237_s10 = sand.u32 (!%p209_p10), 1, %s2828_s19  }
  0x11   : > { %s2957_s9 = scalar_select %p147_p11, %s2832_s20, %s149_s8  }
  0x12   : > { %p239_p12 = scmp.lt.s32.totalorder (!%p209_p10), %s2840_s22, 1  ;;  %p241_p13 = scmp.lt.s32.totalorder (!%p209_p10), %s2836_s21, 1 }
  0x13   : > { %s2971_s7 = scalar_lea.vmem (!%p209_p10), [#allocation3], %s237_s10  ;;  %p2095_p0 = scmp.ne.s32.totalorder (!%p209_p10), %s2836_s21, 0 }
  0x17   : > { %s240_s11 = scalar_select %p239_p12, %s2840_s22, 1 }
  0x18   : > { %s242_s12 = scalar_select %p241_p13, %s2836_s21, 1 }
  0x19   : > { %s2671_s13 = smul.u32 60, %s240_s11  ;;  %v2854_v0 = vmov (!%p2095_p0), 0.0  }
  0x1a   : > { %s2670_s14 = smul.u32 30, %s242_s12  ;;  %253 = vst [vmem:[#allocation2] sm:$0x1] (!%p2095_p0), %v2854_v0 }
  0x1b   : > { %252 = sbr.rel (%p2095_p0) target bundleno = 34 (0x22), region = 44 }
  0x1c   : > { %s245_s15 = sadd.s32 %s2671_s13, %s2670_s14 }
  0x1d   : > { %s2094_s16 = sshll.u32 %s245_s15, 2 }
  0x1e   : > { %s2967_s27 = scalar_lea.vmem %s3621_s0, %s2094_s16 }
  0x22 PF: > { %v2096_v1 = vld [vmem:[%s3622_s1 + $0x2] sm:$0x3]  ;;  %vm531_vm0 = vcmask 1040384   ;;  %vm532_vm1 = vcmask 1041408   ;;  %v2855_v2 = vmov 65535   ;;  %vm506_vm5 = vcmask 23552  }
  0x23   : > { %v533_v3 = vsel %vm531_vm0, 4294967295, %v2855_v2  ;;  %v2164_v4 = vld [vmem:[%s3622_s1 + $0x8] sm:$0x3]  ;;  %v2981_v5 = vld [vmem:[%s2967_s27] sm:$0xf]  ;;  %vm807_vm6 = vcmask 1042432  }
  0x24   : > { %v2983_v6 = vsel %vm532_vm1, %v533_v3, 0  ;;  %v2986_v7 = vld [vmem:[%s2967_s27 + $0x4] sm:$0xf]  ;;  %v2989_v8 = vld [vmem:[%s2967_s27 + $0x8] sm:$0x1]  ;;  %v289_v9 = vshrl.u32 %v2981_v5, 16 }
  0x25   : > { %v536_v10 = vand.u32 %v2096_v1, %v2983_v6  ;;  %v2994_v11 = vand.u32 %v2164_v4, %v2983_v6  ;;  %vm285_vm2 = vsmask.f32 3328  ;;  %vm286_vm3 = vsmask.f32 7440  ;;  %v284_v12 = vld [vmem:[%s3622_s1] sm:$0x3] }
  0x26   : > { %v291_v13 = vrot.slane %v289_v9, 4  ;;  %v292_v14 = vshll.u32 %v2981_v5, 16  ;;  %v298_v15 = vshll.u32 %v2986_v7, 16  ;;  %v302_v16 = vshrl.u32 %v2986_v7, 16  ;;  %v3003_v17 = vld [vmem:[%s2967_s27 + $0xc] sm:$0xf]  ;;  %vm3031_vm4 = vmor %vm285_vm2, %vm286_vm3 }
  0x27   : > { %2319 = vmatprep.subr.bf16.mxu1 %v536_v10  ;;  %2391 = vmatprep.subr.bf16.mxu0 %v2994_v11  ;;  %v308_v18 = vshll.u32 %v2989_v8, 16  ;;  %v3008_v19 = vand.u32 %v2983_v6, %v284_v12  ;;  %v3011_v20 = vld [vmem:[%s2967_s27 + $0x10] sm:$0xf]  ;;  %v3014_v21 = vld [vmem:[%s2967_s27 + $0x14] sm:$0x1]  ;;  %v313_v25 = vshrl.u32 %v3003_v17, 16 }
  0x28   : > { %2320 = vmatpush3.bf16.msra.mxu1 %v536_v10  ;;  %2392 = vmatpush3.bf16.msra.mxu0 %v2994_v11  ;;  %v294_v22 = vrot.slane %v292_v14, 5  ;;  %v300_v23 = vrot.slane %v298_v15, 5  ;;  %v304_v24 = vrot.slane %v302_v16, 4  ;;  %v316_v27 = vshll.u32 %v3003_v17, 16  ;;  %v2175_v34 = vld [vmem:[%s3622_s1 + $0xa] sm:$0x3] }
  0x29   : > { %v310_v26 = vrot.slane %v308_v18, 5  ;;  %2337 = vmatprep.subr.bf16.mxu1 %v3008_v19  ;;  %v322_v28 = vshll.u32 %v3011_v20, 16  ;;  %v326_v29 = vshrl.u32 %v3011_v20, 16  ;;  %v315_v32 = vrot.slane %v313_v25, 4  ;;  %v3027_v35 = vld [vmem:[%s2967_s27 + $0x18] sm:$0xf] }
  0x2a   : > { %v295_v30 = vor.u32 %v294_v22, %v291_v13  ;;  %v305_v31 = vor.u32 %v304_v24, %v300_v23  ;;  %v332_v33 = vshll.u32 %v3014_v21, 16  ;;  %v318_v37 = vrot.slane %v316_v27, 5  ;;  %v3036_v40 = vld [vmem:[%s2967_s27 + $0x1c] sm:$0xf]  ;;  %v3043_v48 = vld [vmem:[%s2967_s27 + $0x20] sm:$0x1] }
  0x2b   : > { %v324_v38 = vrot.slane %v322_v28, 5  ;;  %v328_v39 = vrot.slane %v326_v29, 4  ;;  %v822_v44 = vrot.slane %v3014_v21, 5  ;;  %v3040_v47 = vand.u32 %v2175_v34, %v2983_v6  ;;  %v3054_v58 = vld [vmem:[%s2967_s27 + $0x24] sm:$0xf]  ;;  %p2217_p1 = scmp.ne.s32.totalorder %s2836_s21, 1 }
  0x2c   : > { %v296_v41 = vrot.slane %v295_v30, 4  ;;  %v306_v42 = vrot.slane %v305_v31, 4  ;;  %v334_v43 = vrot.slane %v332_v33, 5  ;;  %v319_v45 = vor.u32 %v318_v37, %v315_v32  ;;  %v3059_v63 = vld [vmem:[%s2967_s27 + $0x28] sm:$0xf] }
  0x2d   : > { %v329_v46 = vor.u32 %v328_v39, %v324_v38  ;;  %v337_v49 = vshrl.u32 %v3027_v35, 16  ;;  %v340_v52 = vshll.u32 %v3027_v35, 16  ;;  %v346_v53 = vshll.u32 %v3036_v40, 16  ;;  %2409 = vmatprep.subr.bf16.mxu0 %v3040_v47  ;;  %v3069_v4 = vld [vmem:[%s2967_s27 + $0x2c] sm:$0x1] }
  0x2e   : > { %v301_v50 = vsel %vm3031_vm4, %v296_v41, %v300_v23  ;;  %v311_v51 = vsel %vm3031_vm4, %v306_v42, %v310_v26  ;;  %v320_v55 = vrot.slane %v319_v45, 4  ;;  %v350_v61 = vshrl.u32 %v3036_v40, 16  ;;  %v3072_v9 = vld [vmem:[%s2967_s27 + $0x30] sm:$0xf]  ;;  %v3082_v26 = vld [vmem:[%s2967_s27 + $0x34] sm:$0xf] }
  0x2f   : > { %v2097_v54 = vcombine.low %v301_v50, %v311_v51  ;;  %v330_v56 = vrot.slane %v329_v46, 4  ;;  %v339_v57 = vrot.slane %v337_v49, 4  ;;  %v342_v59 = vrot.slane %v340_v52, 5  ;;  %v3087_v32 = vld [vmem:[%s2967_s27 + $0x38] sm:$0x1] }
  0x30   : > { %v348_v60 = vrot.slane %v346_v53, 5  ;;  %v356_v62 = vshll.u32 %v3043_v48, 16  ;;  %v325_v0 = vsel %vm3031_vm4, %v320_v55, %v324_v38  ;;  %v826_v2 = vrot.slane %v3036_v40, 5  ;;  %v2185_v49 = vld [vmem:[%s3622_s1 + $0xc] sm:$0x3] }
  0x31   : > { %2321 = vmatprep.mubr.msk.bf16.mxu1 %vm506_vm5, %v2097_v54  ;;  %v335_v1 = vsel %vm3031_vm4, %v330_v56, %v334_v43  ;;  %v829_v3 = vrot.slane %v3043_v48, 5  ;;  %v343_v12 = vor.u32 %v342_v59, %v339_v57  ;;  %v352_v13 = vrot.slane %v350_v61, 4  ;;  %v3103_v54 = vld [vmem:[%s2967_s27 + $0x3c] sm:$0xf]  ;;  %v3496_v59 = vld [vmem:[%s3623_s2] ss:$0 sm:$0xff] }
  0x32   : > { %v2098_v10 = vcombine.low %v325_v0, %v335_v1  ;;  %v358_v14 = vrot.slane %v356_v62, 5  ;;  %v361_v15 = vshrl.u32 %v3054_v58, 16  ;;  %v364_v16 = vshll.u32 %v3054_v58, 16 }
  0x33   : > { %v370_v18 = vshll.u32 %v3059_v63, 16  ;;  %v374_v22 = vshrl.u32 %v3059_v63, 16  ;;  %v344_v23 = vrot.slane %v343_v12, 4  ;;  %v353_v24 = vor.u32 %v352_v13, %v348_v60 }
  0x34   : > { %2393 = vmatprep.mubr.msk.bf16.mxu0 %vm506_vm5, %v2098_v10  ;;  %2322 = vmatmul.mubr.msk.bf16.vlgmr.msra.gmra.mrb[0].mxu1 %vm506_vm5, %v2098_v10  ;;  %v380_v25 = vshll.u32 %v3069_v4, 16  ;;  %v385_v27 = vshrl.u32 %v3072_v9, 16  ;;  %v363_v28 = vrot.slane %v361_v15, 4  ;;  %v366_v29 = vrot.slane %v364_v16, 5  ;;  %v3121_v10 = vld [vmem:[%s2967_s27 + $0x40] sm:$0xf] }
  0x35   : > { %2338 = vmatpush3.bf16.msra.mxu1 %v3008_v19  ;;  %v372_v30 = vrot.slane %v370_v18, 5  ;;  %v376_v31 = vrot.slane %v374_v22, 4  ;;  %v349_v33 = vsel %vm3031_vm4, %v344_v23, %v348_v60  ;;  %v354_v34 = vrot.slane %v353_v24, 4  ;;  %v3130_v15 = vld [vmem:[%s2967_s27 + $0x44] sm:$0x1] }
  0x36   : > { %v382_v37 = vrot.slane %v380_v25, 5  ;;  %v387_v38 = vrot.slane %v385_v27, 4  ;;  %v367_v39 = vor.u32 %v366_v29, %v363_v28  ;;  %v388_v42 = vshll.u32 %v3072_v9, 16 }
  0x37   : > { %v377_v41 = vor.u32 %v376_v31, %v372_v30  ;;  %v394_v43 = vshll.u32 %v3082_v26, 16  ;;  %v359_v19 = vsel %vm3031_vm4, %v354_v34, %v358_v14  ;;  %v398_v45 = vshrl.u32 %v3082_v26, 16  ;;  %v3151_v34 = vld [vmem:[%s2967_s27 + $0x48] sm:$0xf] }
  0x38   : > { %v404_v46 = vshll.u32 %v3087_v32, 16  ;;  %vm808_vm7 = vcmask 1046532   ;;  %v3100_v50 = vcombine.low %v349_v33, %v359_v19  ;;  %v368_v51 = vrot.slane %v367_v39, 4 }
  0x39   : > { %v378_v52 = vrot.slane %v377_v41, 4  ;;  %v390_v53 = vrot.slane %v388_v42, 5  ;;  %v396_v55 = vrot.slane %v394_v43, 5  ;;  %v400_v56 = vrot.slane %v398_v45, 4  ;;  %vm3106_vm8 = vmor %vm807_vm6, %vm808_vm7  ;;  %v3158_v42 = vld [vmem:[%s2967_s27 + $0x4c] sm:$0xf] }
  0x3a   : > { %v406_v57 = vrot.slane %v404_v46, 5  ;;  %v2130_v60 = vrot.slane %v3003_v17, 9  ;;  %2394 = vmatmul.mubr.msk.bf16.vlgmr.msra.gmra.mrb[0].mxu0 %vm506_vm5, %v3100_v50  ;;  %2325 = vmatprep.mubr.msk.bf16.mxu1 %vm506_vm5, %v3100_v50  ;;  %v373_v61 = vsel %vm3031_vm4, %v368_v51, %v372_v30  ;;  %v819_v1 = vrot.slane %v3011_v20, 5 }
  0x3b   : > { %v383_v62 = vsel %vm3031_vm4, %v378_v52, %v382_v37  ;;  %v391_v0 = vor.u32 %v390_v53, %v387_v38  ;;  %2410 = vmatpush3.bf16.msra.mxu0 %v3040_v47  ;;  %v401_v13 = vor.u32 %v400_v56, %v396_v55  ;;  %v3127_v14 = vand.u32 %v2185_v49, %v2983_v6 }
  0x3c   : > { %v3124_v12 = vcombine.low %v373_v61, %v383_v62  ;;  %v409_v16 = vshrl.u32 %v3103_v54, 16  ;;  %v820_v22 = vsel %vm3106_vm8, %v2130_v60, %v819_v1  ;;  %v821_v23 = vrot.slane %v819_v1, 4 }
  0x3d   : > { %v392_v18 = vrot.slane %v391_v0, 4  ;;  %v412_v24 = vshll.u32 %v3103_v54, 16  ;;  %v402_v47 = vrot.slane %v401_v13, 4  ;;  %v418_v27 = vshll.u32 %v3121_v10, 16  ;;  %2427 = vmatprep.subr.bf16.mxu0 %v3127_v14 }
  0x3e   : > { %2397 = vmatprep.mubr.msk.bf16.mxu0 %vm506_vm5, %v3124_v12  ;;  %2326 = vmatmul.mubr.msk.bf16.gmra.mrb[4].mxu1 %vm506_vm5, %v3124_v12  ;;  %v411_v25 = vrot.slane %v409_v16, 4  ;;  %v422_v28 = vshrl.u32 %v3121_v10, 16  ;;  %v823_v30 = vsel %vm3106_vm8, %v821_v23, %v822_v44  ;;  %v428_v33 = vshll.u32 %v3130_v15, 16 }
  0x3f   : > { %v397_v29 = vsel %vm3031_vm4, %v392_v18, %v396_v55  ;;  %v414_v31 = vrot.slane %v412_v24, 5  ;;  %v407_v37 = vsel %vm3031_vm4, %v402_v47, %v406_v57  ;;  %v3155_v38 = vcombine.low %v820_v22, %v823_v30  ;;  %v3176_v55 = vld [vmem:[%s2967_s27 + $0x50] sm:$0x1]  ;;  %v3191_v18 = vld [vmem:[%s2967_s27 + $0x54] sm:$0xf] }
  0x40   : > { %v420_v39 = vrot.slane %v418_v27, 5  ;;  %v424_v41 = vrot.slane %v422_v28, 4  ;;  %v3160_v21 = vcombine.low %v397_v29, %v407_v37  ;;  %v430_v43 = vrot.slane %v428_v33, 5  ;;  %v3198_v24 = vld [vmem:[%s2967_s27 + $0x58] sm:$0xf] }
  0x41   : > { %v415_v44 = vor.u32 %v414_v31, %v411_v25  ;;  %v2131_v19 = vrot.slane %v3027_v35, 9  ;;  %v828_v46 = vrot.slane %v826_v2, 4  ;;  %v433_v49 = vshrl.u32 %v3151_v34, 16  ;;  %v3205_v31 = vld [vmem:[%s2967_s27 + $0x5c] sm:$0x1] }
  0x42   : > { %v425_v45 = vor.u32 %v424_v41, %v420_v39  ;;  %v436_v51 = vshll.u32 %v3151_v34, 16  ;;  %2398 = vmatmul.mubr.msk.bf16.gmra.mrb[4].mxu0 %vm506_vm5, %v3160_v21  ;;  %2329 = vmatprep.mubr.msk.bf16.mxu1 %vm506_vm5, %v3160_v21  ;;  %v442_v56 = vshll.u32 %v3158_v42, 16  ;;  %v446_v57 = vshrl.u32 %v3158_v42, 16 }
  0x43   : > { %v416_v52 = vrot.slane %v415_v44, 4  ;;  %v827_v53 = vsel %vm3106_vm8, %v2131_v19, %v826_v2  ;;  %2411 = vmatprep.mubr.msk.bf16.mxu0 %vm506_vm5, %v3155_v38  ;;  %v830_v61 = vsel %vm3106_vm8, %v828_v46, %v829_v3  ;;  %v435_v62 = vrot.slane %v433_v49, 4 }
  0x44   : > { %v426_v60 = vrot.slane %v425_v45, 4  ;;  %v438_v0 = vrot.slane %v436_v51, 5  ;;  %v3188_v1 = vcombine.low %v827_v53, %v830_v61  ;;  %v444_v13 = vrot.slane %v442_v56, 5  ;;  %v2137_v56 = vld [vmem:[%s3622_s1 + $0x4] sm:$0x3] }
  0x45   : > { %v421_v2 = vsel %vm3031_vm4, %v416_v52, %v420_v39  ;;  %v448_v16 = vrot.slane %v446_v57, 4  ;;  %v452_v48 = vshll.u32 %v3176_v55, 16  ;;  %v2132_v3 = vrot.slane %v3054_v58, 9 }
  0x46   : > { %v431_v22 = vsel %vm3031_vm4, %v426_v60, %v430_v43  ;;  %v439_v23 = vor.u32 %v438_v0, %v435_v62  ;;  %v833_v27 = vrot.slane %v3059_v63, 5  ;;  %v836_v28 = vrot.slane %v3069_v4, 5 }
  0x47   : > { %v3200_v47 = vcombine.low %v421_v2, %v431_v22  ;;  %v449_v25 = vor.u32 %v448_v16, %v444_v13  ;;  %v454_v30 = vrot.slane %v452_v48, 5  ;;  %v457_v33 = vshrl.u32 %v3191_v18, 16 }
  0x48   : > { %v440_v29 = vrot.slane %v439_v23, 4  ;;  %v460_v37 = vshll.u32 %v3191_v18, 16  ;;  %v834_v41 = vsel %vm3106_vm8, %v2132_v3, %v833_v27  ;;  %v835_v44 = vrot.slane %v833_v27, 4 }
  0x49   : > { %2330 = vmatmul.mubr.msk.bf16.gmra.mrb[8].mxu1 %vm506_vm5, %v3200_v47  ;;  %v450_v39 = vrot.slane %v449_v25, 4  ;;  %v466_v43 = vshll.u32 %v3198_v24, 16  ;;  %v459_v19 = vrot.slane %v457_v33, 4  ;;  %v470_v46 = vshrl.u32 %v3198_v24, 16 }
  0x4a   : > { %v445_v4 = vsel %vm3031_vm4, %v440_v29, %v444_v13  ;;  %v462_v45 = vrot.slane %v460_v37, 5  ;;  %2412 = vmatmul.mubr.msk.bf16.vlgmr.msra.gmra.mrb[0].mxu0 %vm506_vm5, %v3188_v1  ;;  %v837_v51 = vsel %vm3106_vm8, %v835_v44, %v836_v28  ;;  %v476_v53 = vshll.u32 %v3205_v31, 16 }
  0x4b   : > { %v455_v49 = vsel %vm3031_vm4, %v450_v39, %v454_v30  ;;  %v468_v52 = vrot.slane %v466_v43, 5  ;;  %2428 = vmatpush3.bf16.msra.mxu0 %v3127_v14  ;;  %v3230_v60 = vcombine.low %v834_v41, %v837_v51  ;;  %v472_v62 = vrot.slane %v470_v46, 4 }
  0x4c   : > { %v3228_v57 = vcombine.low %v445_v4, %v455_v49  ;;  %v463_v61 = vor.u32 %v462_v45, %v459_v19  ;;  %v478_v0 = vrot.slane %v476_v53, 5  ;;  %v2133_v2 = vrot.slane %v3072_v9, 9  ;;  %v3261_v45 = vld [vmem:[%s2967_s27 + $0x64] sm:$0xf] }
  0x4d   : > { %v840_v13 = vrot.slane %v3082_v26, 5  ;;  %v843_v16 = vrot.slane %v3087_v32, 5  ;;  %2415 = vmatprep.mubr.msk.bf16.mxu0 %vm506_vm5, %v3230_v60  ;;  %v473_v22 = vor.u32 %v472_v62, %v468_v52  ;;  %v917_v23 = vand.u32 %v2137_v56, %v2983_v6  ;;  %v2195_v56 = vld [vmem:[%s3622_s1 + $0xe] sm:$0x3] }
  0x4e   : > { %2333 = vmatprep.mubr.msk.bf16.mxu1 %vm506_vm5, %v3228_v57  ;;  %v464_v14 = vrot.slane %v463_v61, 4  ;;  %v2134_v48 = vrot.slane %v3103_v54, 9  ;;  %v847_v27 = vrot.slane %v3121_v10, 5  ;;  %v850_v32 = vrot.slane %v3130_v15, 5 }
  0x4f   : > { %v841_v3 = vsel %vm3106_vm8, %v2133_v2, %v840_v13  ;;  %v842_v25 = vrot.slane %v840_v13, 4  ;;  %v474_v29 = vrot.slane %v473_v22, 4  ;;  %2355 = vmatprep.subr.bf16.mxu1 %v917_v23  ;;  %v2135_v30 = vrot.slane %v3151_v34, 9 }
  0x50   : > { %v469_v28 = vsel %vm3031_vm4, %v464_v14, %v468_v52  ;;  %v854_v33 = vrot.slane %v3158_v42, 5  ;;  %v848_v39 = vsel %vm3106_vm8, %v2134_v48, %v847_v27  ;;  %v849_v41 = vrot.slane %v847_v27, 4 }
  0x51   : > { %v844_v37 = vsel %vm3106_vm8, %v842_v25, %v843_v16  ;;  %v857_v44 = vrot.slane %v3176_v55, 5  ;;  %v479_v15 = vsel %vm3031_vm4, %v474_v29, %v478_v0  ;;  %v2113_v4 = vcombine.low %v2981_v5, %v2986_v7  ;;  %v3284_v0 = vld [vmem:[%s2967_s27 + $0x60] sm:$0xf]  ;;  %v3293_v16 = vld [vmem:[%s2967_s27 + $0x68] sm:$0x1] }
  0x52   : > { %v3256_v43 = vcombine.low %v841_v3, %v844_v37  ;;  %v856_v19 = vrot.slane %v854_v33, 4  ;;  %v3263_v46 = vcombine.low %v469_v28, %v479_v15  ;;  %v851_v49 = vsel %vm3106_vm8, %v849_v41, %v850_v32  ;;  %v2154_v28 = vld [vmem:[%s3622_s1 + $0x6] sm:$0x3] }
  0x53   : > { %v2136_v55 = vrot.slane %v3191_v18, 9  ;;  %v3270_v51 = vcombine.low %v848_v39, %v851_v49  ;;  %v861_v52 = vrot.slane %v3198_v24, 5  ;;  %v864_v53 = vrot.slane %v3205_v31, 5 }
  0x54   : > { %2416 = vmatmul.mubr.msk.bf16.gmra.mrb[4].mxu0 %vm506_vm5, %v3256_v43  ;;  %2334 = vmatmul.mubr.msk.bf16.gmra.mrb[12].mxu1 %vm506_vm5, %v3263_v46  ;;  %v855_v61 = vsel %vm3106_vm8, %v2135_v30, %v854_v33  ;;  %v858_v62 = vsel %vm3106_vm8, %v856_v19, %v857_v44  ;;  %v1309_v2 = vrot.slane %v3261_v45, 5  ;;  %v815_v14 = vrot.slane %v2989_v8, 5 }
  0x55   : > { %2339 = vmatprep.mubr.msk.bf16.mxu1 %vm506_vm5, %v2113_v4  ;;  %2419 = vmatprep.mubr.msk.bf16.mxu0 %vm506_vm5, %v3270_v51  ;;  %v862_v31 = vsel %vm3106_vm8, %v2136_v55, %v861_v52  ;;  %v863_v13 = vrot.slane %v861_v52, 4  ;;  %v3298_v22 = vcombine.low %v3003_v17, %v3011_v20  ;;  %v1597_v48 = vand.u32 %v2195_v56, %v2983_v6 }
  0x56   : > { %v3301_v3 = vcombine.low %v855_v61, %v858_v62  ;;  %v2174_v27 = vrot.slane %v3284_v0, 9  ;;  %v2129_v32 = vrot.slane %v2981_v5, 9  ;;  %v1311_v29 = vrot.slane %v1309_v2, 4 }
  0x57   : > { %v865_v25 = vsel %vm3106_vm8, %v863_v13, %v864_v53  ;;  %v1312_v17 = vrot.slane %v3293_v16, 5  ;;  %2445 = vmatprep.subr.bf16.mxu0 %v1597_v48  ;;  %v812_v20 = vrot.slane %v2986_v7, 5  ;;  %v3316_v30 = vcombine.low %v3027_v35, %v3036_v40 }
  0x58   : > { %v3310_v8 = vcombine.low %v862_v31, %v865_v25  ;;  %v1043_v37 = vand.u32 %v2154_v28, %v2983_v6  ;;  %v1310_v7 = vsel %vm3106_vm8, %v2174_v27, %v1309_v2  ;;  %v3339_v44 = vcombine.low %v3054_v58, %v3059_v63  ;;  %v2206_v58 = vld [vmem:[%s3622_s1 + $0x10] sm:$0x3]  ;;  %v283_v25 = vld [vmem:[%s2967_s27 + $0x74] sm:$0x1] }
  0x59   : > { %v813_v33 = vsel %vm3106_vm8, %v2129_v32, %v812_v20  ;;  %v814_v5 = vrot.slane %v812_v20, 4  ;;  %v1313_v35 = vsel %vm3106_vm8, %v1311_v29, %v1312_v17  ;;  %v3343_v15 = vcombine.low %v3072_v9, %v3082_v26 }
  0x5a   : > { %v3335_v41 = vcombine.low %v1310_v7, %v1313_v35  ;;  %v3358_v63 = vcombine.low %v3103_v54, %v3121_v10  ;;  %v3362_v9 = vcombine.low %v3151_v34, %v3158_v42  ;;  %v1729_v26 = vand.u32 %v2206_v58, %v2983_v6  ;;  %v3395_v10 = vld [vmem:[%s2967_s27 + $0x6c] sm:$0xf]  ;;  %v3398_v34 = vld [vmem:[%s2967_s27 + $0x70] sm:$0xf] }
  0x5b   : > { %v816_v40 = vsel %vm3106_vm8, %v814_v5, %v815_v14  ;;  %v3375_v54 = vcombine.low %v3191_v18, %v3198_v24  ;;  %v3386_v6 = vcombine.low %v3284_v0, %v3261_v45  ;;  %v2186_v42 = vcombine.low %v3395_v10, %v3398_v34 }
  0x5c   : > { %2420 = vmatmul.mubr.msk.bf16.gmra.mrb[8].mxu0 %vm506_vm5, %v3301_v3  ;;  %2340 = vmatmul.mubr.msk.bf16.vlgmr.msra.gmra.mrb[0].mxu1 %vm506_vm5, %v3298_v22  ;;  %v2138_v39 = vcombine.low %v813_v33, %v816_v40  ;;  %v1162_v18 = vshll.u32 %v3284_v0, 16  ;;  %v1168_v24 = vshll.u32 %v3261_v45, 16  ;;  %v1568_v52 = vshll.u32 %v3395_v10, 16 }
  0x5d   : > { %2423 = vmatprep.mubr.msk.bf16.mxu0 %vm506_vm5, %v3310_v8  ;;  %2356 = vmatpush3.bf16.msra.mxu1 %v917_v23  ;;  %v1172_v23 = vshrl.u32 %v3261_v45, 16  ;;  %v1578_v53 = vshrl.u32 %v3398_v34, 16  ;;  %v1574_v45 = vshll.u32 %v3398_v34, 16  ;;  %v1178_v61 = vshll.u32 %v3293_v16, 16 }
  0x5e   : > { %2343 = vmatprep.mubr.msk.bf16.mxu1 %vm506_vm5, %v3316_v30  ;;  %2373 = vmatprep.subr.bf16.mxu1 %v1043_v37  ;;  %v1164_v19 = vrot.slane %v1162_v18, 5  ;;  %v1170_v49 = vrot.slane %v1168_v24, 5  ;;  %v1584_v16 = vshll.u32 %v283_v25, 16  ;;  %v2205_v36 = vrot.slane %v3395_v10, 9 }
  0x5f   : > { %v1174_v55 = vrot.slane %v1172_v23, 4  ;;  %v1576_v2 = vrot.slane %v1574_v45, 5  ;;  %v1580_v31 = vrot.slane %v1578_v53, 4  ;;  %vm2857_vm9 = vmmov (!%p2217_p1), 0  }
  0x60   : > { %v1586_v33 = vrot.slane %v1584_v16, 5 }
  0x61   : > { %v1175_v56 = vor.u32 %v1174_v55, %v1170_v49  ;;  %v1581_v27 = vor.u32 %v1580_v31, %v1576_v2 }
  0x63   : > { %v1176_v14 = vrot.slane %v1175_v56, 4  ;;  %v1582_v20 = vrot.slane %v1581_v27, 4 }
  0x64   : > { %2424 = vmatmul.mubr.msk.bf16.gmra.mrb[12].mxu0 %vm506_vm5, %v3335_v41  ;;  %2344 = vmatmul.mubr.msk.bf16.gmra.mrb[4].mxu1 %vm506_vm5, %v3339_v44 }
  0x65   : > { %2429 = vmatprep.mubr.msk.bf16.mxu0 %vm506_vm5, %v3316_v30  ;;  %2347 = vmatprep.mubr.msk.bf16.mxu1 %vm506_vm5, %v3343_v15  ;;  %v1587_v5 = vsel %vm3031_vm4, %v1582_v20, %v1586_v33 }
  0x6c   : > { %2430 = vmatmul.mubr.msk.bf16.vlgmr.msra.gmra.mrb[0].mxu0 %vm506_vm5, %v3339_v44  ;;  %2348 = vmatmul.mubr.msk.bf16.gmra.mrb[8].mxu1 %vm506_vm5, %v3358_v63 }
  0x6d   : > { %2446 = vmatpush3.bf16.msra.mxu0 %v1597_v48  ;;  %2351 = vmatprep.mubr.msk.bf16.mxu1 %vm506_vm5, %v3362_v9  ;;  %v1180_v48 = vrot.slane %v1178_v61, 5 }
  0x6e   : > { %2433 = vmatprep.mubr.msk.bf16.mxu0 %vm506_vm5, %v3343_v15  ;;  %2463 = vmatprep.subr.bf16.mxu0 %v1729_v26 }
  0x6f   : > { %v1181_v28 = vsel %vm3031_vm4, %v1176_v14, %v1180_v48 }
  0x74   : > { %2434 = vmatmul.mubr.msk.bf16.gmra.mrb[4].mxu0 %vm506_vm5, %v3358_v63  ;;  %2352 = vmatmul.mubr.msk.bf16.gmra.mrb[12].mxu1 %vm506_vm5, %v3375_v54 }
  0x75   : > { %2437 = vmatprep.mubr.msk.bf16.mxu0 %vm506_vm5, %v3362_v9  ;;  %2357 = vmatprep.mubr.msk.bf16.mxu1 %vm506_vm5, %v2138_v39 }
  0x7c   : > { %2438 = vmatmul.mubr.msk.bf16.gmra.mrb[8].mxu0 %vm506_vm5, %v3375_v54  ;;  %2358 = vmatmul.mubr.msk.bf16.vlgmr.msra.gmra.mrb[0].mxu1 %vm506_vm5, %v3155_v38  ;;  %v1159_v38 = vshrl.u32 %v3284_v0, 16  ;;  %v1570_v0 = vrot.slane %v1568_v52, 5 }
  0x7d   : > { %2441 = vmatprep.mubr.msk.bf16.mxu0 %vm506_vm5, %v3386_v6  ;;  %2374 = vmatpush3.bf16.msra.mxu1 %v1043_v37 }
  0x7e   : > { %2361 = vmatprep.mubr.msk.bf16.mxu1 %vm506_vm5, %v3188_v1  ;;  %2540 = vmatprep.subr.bf16.mxu1 %v2994_v11  ;;  %v1161_v4 = vrot.slane %v1159_v38, 4 }
  0x84   : > { %2442 = vmatmul.mubr.msk.bf16.gmra.mrb[12].mxu0 %vm506_vm5, %v2186_v42  ;;  %2362 = vmatmul.mubr.msk.bf16.gmra.mrb[4].mxu1 %vm506_vm5, %v3230_v60 }
  0x85   : > { %2447 = vmatprep.mubr.msk.bf16.mxu0 %vm506_vm5, %v3100_v50  ;;  %2365 = vmatprep.mubr.msk.bf16.mxu1 %vm506_vm5, %v3256_v43  ;;  %v1565_v50 = vshrl.u32 %v3395_v10, 16 }
  0x87   : > { %v1567_v62 = vrot.slane %v1565_v50, 4 }
  0x8c   : > { %2448 = vmatmul.mubr.msk.bf16.vlgmr.msra.gmra.mrb[0].mxu0 %vm506_vm5, %v3124_v12  ;;  %2366 = vmatmul.mubr.msk.bf16.gmra.mrb[8].mxu1 %vm506_vm5, %v3270_v51  ;;  %v1165_v12 = vor.u32 %v1164_v19, %v1161_v4 }
  0x8d   : > { %2464 = vmatpush3.bf16.msra.mxu0 %v1729_v26  ;;  %2369 = vmatprep.mubr.msk.bf16.mxu1 %vm506_vm5, %v3301_v3 }
  0x8e   : > { %2451 = vmatprep.mubr.msk.bf16.mxu0 %vm506_vm5, %v3160_v21  ;;  %v1166_v13 = vrot.slane %v1165_v12, 4  ;;  %v1571_v21 = vor.u32 %v1570_v0, %v1567_v62 }
  0x90   : > { %v1171_v32 = vsel %vm3031_vm4, %v1166_v13, %v1170_v49  ;;  %v1572_v17 = vrot.slane %v1571_v21, 4 }
  0x91   : > { %v2165_v29 = vcombine.low %v1171_v32, %v1181_v28 }
  0x94   : > { %2452 = vmatmul.mubr.msk.bf16.gmra.mrb[4].mxu0 %vm506_vm5, %v3200_v47  ;;  %2370 = vmatmul.mubr.msk.bf16.gmra.mrb[12].mxu1 %vm506_vm5, %v3310_v8 }
  0x95   : > { %2455 = vmatprep.mubr.msk.bf16.mxu0 %vm506_vm5, %v3228_v57  ;;  %2375 = vmatprep.mubr.msk.bf16.mxu1 %vm506_vm5, %v3298_v22  ;;  %v1577_v22 = vsel %vm3031_vm4, %v1572_v17, %v1576_v2 }
  0x96   : > { %v2196_v37 = vcombine.low %v1577_v22, %v1587_v5 }
  0x9c   : > { %2456 = vmatmul.mubr.msk.bf16.gmra.mrb[8].mxu0 %vm506_vm5, %v3263_v46  ;;  %2376 = vmatmul.mubr.msk.bf16.vlgmr.msra.gmra.mrb[0].mxu1 %vm506_vm5, %v3316_v30 }
  0x9d   : > { %2459 = vmatprep.mubr.msk.bf16.mxu0 %vm506_vm5, %v2165_v29  ;;  %2541 = vmatpush3.bf16.msra.mxu1 %v2994_v11  ;;  %v1715_v11 = vrot.slane %v3398_v34, 5 }
  0x9e   : > { %2379 = vmatprep.mubr.msk.bf16.mxu1 %vm506_vm5, %v3339_v44 }
  0xa4   : > { %2460 = vmatmul.mubr.msk.bf16.gmra.mrb[12].mxu0 %vm506_vm5, %v2196_v37  ;;  %2380 = vmatmul.mubr.msk.bf16.gmra.mrb[4].mxu1 %vm506_vm5, %v3343_v15 }
  0xa5   : > { %2465 = vmatprep.mubr.msk.bf16.mxu0 %vm506_vm5, %v3188_v1  ;;  %2383 = vmatprep.mubr.msk.bf16.mxu1 %vm506_vm5, %v3358_v63  ;;  %v1717_v1 = vrot.slane %v1715_v11, 4 }
  0xac   : > { %2466 = vmatmul.mubr.msk.bf16.vlgmr.msra.gmra.mrb[0].mxu0 %vm506_vm5, %v3230_v60  ;;  %2384 = vmatmul.mubr.msk.bf16.gmra.mrb[8].mxu1 %vm506_vm5, %v3362_v9  ;;  %v1718_v60 = vrot.slane %v283_v25, 5 }
  0xad   : > { %2469 = vmatprep.mubr.msk.bf16.mxu0 %vm506_vm5, %v3256_v43  ;;  %2387 = vmatprep.mubr.msk.bf16.mxu1 %vm506_vm5, %v3375_v54  ;;  %v1716_v43 = vsel %vm3106_vm8, %v2205_v36, %v1715_v11 }
  0xb4   : > { %2470 = vmatmul.mubr.msk.bf16.gmra.mrb[4].mxu0 %vm506_vm5, %v3270_v51  ;;  %2388 = vmatmul.mubr.msk.bf16.gmra.mrb[12].mxu1 %vm506_vm5, %v3386_v6  ;;  %v1719_v51 = vsel %vm3106_vm8, %v1717_v1, %v1718_v60 }
  0xb5   : > { %2473 = vmatprep.mubr.msk.bf16.mxu0 %vm506_vm5, %v3301_v3  ;;  %2401 = vmatprep.mubr.msk.bf16.mxu1 %vm506_vm5, %v3200_v47  ;;  %v2207_v47 = vcombine.low %v1716_v43, %v1719_v51 }
  0xbc   : > { %2474 = vmatmul.mubr.msk.bf16.gmra.mrb[8].mxu0 %vm506_vm5, %v3310_v8  ;;  %2402 = vmatmul.mubr.msk.bf16.vlgmr.msra.gmra.mrb[8].mxu1 %vm506_vm5, %v3228_v57 }
  0xbd   : > { %2477 = vmatprep.mubr.msk.bf16.mxu0 %vm506_vm5, %v3335_v41  ;;  %2405 = vmatprep.mubr.msk.bf16.mxu1 %vm506_vm5, %v3263_v46 }
  0xc4   : > { %2478 = vmatmul.mubr.msk.bf16.gmra.mrb[12].mxu0 %vm506_vm5, %v2207_v47  ;;  %2406 = vmatmul.mubr.msk.bf16.gmra.mrb[12].mxu1 %vm506_vm5, %v2165_v29 }
 0x16f   : > { %v2377_v3 = vpop.f32.mrb[0].mxu1 }
 0x170   : > { %v1079_v8 = vpop.f32.mrb[1].mxu1 }
 0x171   : > { %v2378_v57 = vpop.f32.mrb[2].mxu1 }
 0x172   : > { %v1082_v30 = vpop.f32.mrb[3].mxu1 }
 0x177   : > { %v2381_v7 = vpop.f32.mrb[4].mxu1 }
 0x178   : > { %v1095_v35 = vpop.f32.mrb[5].mxu1 }
 0x179   : > { %v2382_v40 = vpop.f32.mrb[6].mxu1 }
 0x17a   : > { %v1098_v39 = vpop.f32.mrb[7].mxu1 }
 0x17f   : > { %v2467_v41 = vpop.f32.mrb[0].mxu0 }
 0x180   : > { %v2542_v44 = vadd.f32 %v2467_v41, %v2377_v3  ;;  %v1765_v46 = vpop.f32.mrb[1].mxu0 }
 0x181   : > { %v2543_v15 = vadd.f32 %v1765_v46, %v1079_v8  ;;  %v2468_v58 = vpop.f32.mrb[2].mxu0 }
 0x182   : > { %v2544_v63 = vadd.f32 %v2468_v58, %v2378_v57  ;;  %v1768_v9 = vpop.f32.mrb[3].mxu0  ;;  %v1853_v6 = vadd.f32 %v2542_v44, %v3496_v59 }
 0x183   : > { %v1851_v26 = vadd.f32 %v2543_v15, %v3496_v59  ;;  %v2545_v54 = vadd.f32 %v1768_v9, %v1082_v30 }
 0x184   : > { %v1854_v42 = vadd.f32 %v2544_v63, %v3496_v59  ;;  %v1869_v4 = vmax.f32 %v1853_v6, 0.0 }
 0x185   : > { %v1852_v10 = vadd.f32 %v2545_v54, %v3496_v59  ;;  %v1867_v34 = vmax.f32 %v1851_v26, 0.0 }
 0x186   : > { %v1870_v53 = vmax.f32 %v1854_v42, 0.0 }
 0x187   : > { %v1868_v38 = vmax.f32 %v1852_v10, 0.0  ;;  %v2471_v18 = vpop.f32.mrb[4].mxu0 }
 0x188   : > { %v2546_v24 = vadd.f32 %v2471_v18, %v2381_v7  ;;  %v1781_v23 = vpop.f32.mrb[5].mxu0 }
 0x189   : > { %v1884_v19 = vadd.f32 %v1868_v38, %v1867_v34  ;;  %v2547_v49 = vadd.f32 %v1781_v23, %v1095_v35  ;;  %v2472_v55 = vpop.f32.mrb[6].mxu0 }
 0x18a   : > { %v2548_v50 = vadd.f32 %v2472_v55, %v2382_v40  ;;  %v1784_v52 = vpop.f32.mrb[7].mxu0  ;;  %v1857_v61 = vadd.f32 %v2546_v24, %v3496_v59 }
 0x18b   : > { %v1885_v45 = vadd.f32 %v1884_v19, %v1869_v4  ;;  %v1855_v12 = vadd.f32 %v2547_v49, %v3496_v59  ;;  %v2549_v56 = vadd.f32 %v1784_v52, %v1098_v39 }
 0x18c   : > { %v1858_v13 = vadd.f32 %v2548_v50, %v3496_v59  ;;  %v1873_v27 = vmax.f32 %v1857_v61, 0.0 }
 0x18d   : > { %v1871_v62 = vmax.f32 %v1855_v12, 0.0  ;;  %v1886_v0 = vadd.f32 %v1885_v45, %v1870_v53  ;;  %v1856_v2 = vadd.f32 %v2549_v56, %v3496_v59 }
 0x18e   : > { %v1874_v22 = vmax.f32 %v1858_v13, 0.0  ;;  %v1914_v13 = vld [vmem:[%s3624_s3 + $0x8] sm:$0xff] (!%p2217_p1) }
 0x18f   : > { %v1887_v31 = vadd.f32 %v1886_v0, %v1871_v62  ;;  %v1872_v14 = vmax.f32 %v1856_v2, 0.0  ;;  %v2475_v48 = vpop.f32.mrb[8].mxu0  ;;  %v2403_v25 = vpop.f32.mrb[8].mxu1  ;;  %v1883_v0 = vld [vmem:[#allocation2] sm:$0x1] }
 0x190   : > { %v1797_v21 = vpop.f32.mrb[9].mxu0  ;;  %v2550_v32 = vadd.f32 %v2475_v48, %v2403_v25  ;;  %v1259_v28 = vpop.f32.mrb[9].mxu1  ;;  %v2856_v48 = vmov (!%p2217_p1), 0.0|0.0  }
 0x191   : > { %v1888_v16 = vadd.f32 %v1887_v31, %v1872_v14  ;;  %v2476_v29 = vpop.f32.mrb[10].mxu0  ;;  %v2551_v17 = vadd.f32 %v1797_v21, %v1259_v28  ;;  %v2404_v20 = vpop.f32.mrb[10].mxu1  ;;  %v1915_v14 = vld [vmem:[%s3624_s3 + $0x10] sm:$0xff] (!%p2217_p1)  ;;  %2516 = vmatprep.subr.bf16.mxu0 (!%p2217_p1), %v2856_v48  ;;  %v1916_v21 = vld [vmem:[%s3624_s3 + $0x18] sm:$0xff] (!%p2217_p1)  ;;  %v1918_v28 = vld [vmem:[%s3624_s3 + $0x28] sm:$0xff] (!%p2217_p1) }
 0x192   : > { %v1800_v33 = vpop.f32.mrb[11].mxu0  ;;  %v2552_v37 = vadd.f32 %v2476_v29, %v2404_v20  ;;  %v1262_v11 = vpop.f32.mrb[11].mxu1  ;;  %v1861_v43 = vadd.f32 %v2550_v32, %v3496_v59  ;;  %v1917_v32 = vld [vmem:[%s3624_s3 + $0x20] sm:$0xff] (!%p2217_p1)  ;;  %v1920_v20 = vld [vmem:[%s3624_s3 + $0x38] sm:$0xff] (!%p2217_p1) }
 0x193   : > { %v1889_v5 = vadd.f32 %v1888_v16, %v1873_v27  ;;  %v1859_v36 = vadd.f32 %v2551_v17, %v3496_v59  ;;  %v2553_v1 = vadd.f32 %v1800_v33, %v1262_v11  ;;  %v2858_v27 = vmov (!%p2217_p1), 0.0   ;;  %v1919_v17 = vld [vmem:[%s3624_s3 + $0x30] sm:$0xff] (!%p2217_p1) }
 0x194   : > { %v1862_v57 = vadd.f32 %v2552_v37, %v3496_v59  ;;  %v1877_v44 = vmax.f32 %v1861_v43, 0.0  ;;  %2513 = vmatprep.mubr.msk.f32.mxu0 (!%p2217_p1), %vm2857_vm9, %v2858_v27  ;;  %v2520_v16 = vpack.c.bf16 (!%p2217_p1), %v1916_v21, %v1915_v14  ;;  %v2523_v29 = vpack.c.bf16 (!%p2217_p1), %v1918_v28, %v1917_v32  ;;  %v1923_v11 = vld [vmem:[%s3624_s3 + $0x50] sm:$0xff] (!%p2217_p1)  ;;  %v1926_v43 = vld [vmem:[%s3624_s3 + $0x68] sm:$0xff] (!%p2217_p1) }
 0x195   : > { %v1890_v60 = vadd.f32 %v1889_v5, %v1874_v22  ;;  %v1875_v51 = vmax.f32 %v1859_v36, 0.0  ;;  %v1860_v47 = vadd.f32 %v2553_v1, %v3496_v59  ;;  %v2526_v33 = vpack.c.bf16 (!%p2217_p1), %v1920_v20, %v1919_v17  ;;  %v1921_v22 = vld [vmem:[%s3624_s3 + $0x40] sm:$0xff] (!%p2217_p1)  ;;  %v1922_v5 = vld [vmem:[%s3624_s3 + $0x48] sm:$0xff] (!%p2217_p1)  ;;  %v1924_v36 = vld [vmem:[%s3624_s3 + $0x58] sm:$0xff] (!%p2217_p1) }
 0x196   : > { %v1878_v54 = vmax.f32 %v1862_v57, 0.0  ;;  %v2529_v37 = vpack.c.bf16 (!%p2217_p1), %v1922_v5, %v1921_v22  ;;  %v2532_v1 = vpack.c.bf16 (!%p2217_p1), %v1924_v36, %v1923_v11 }
 0x197   : > { %v2479_v3 = vpop.f32.mrb[12].mxu0  ;;  %v1891_v8 = vadd.f32 %v1890_v60, %v1875_v51  ;;  %v1876_v30 = vmax.f32 %v1860_v47, 0.0  ;;  %v2407_v7 = vpop.f32.mrb[12].mxu1  ;;  %v1925_v60 = vld [vmem:[%s3624_s3 + $0x60] sm:$0xff] (!%p2217_p1)  ;;  %v1927_v47 = vld [vmem:[%s3624_s3 + $0x70] sm:$0xff] (!%p2217_p1) }
 0x198   : > { %v1813_v35 = vpop.f32.mrb[13].mxu0  ;;  %v2554_v40 = vadd.f32 %v2479_v3, %v2407_v7  ;;  %v1275_v39 = vpop.f32.mrb[13].mxu1  ;;  %v2535_v51 = vpack.c.bf16 (!%p2217_p1), %v1926_v43, %v1925_v60  ;;  %v1928_v3 = vld [vmem:[%s3624_s3 + $0x78] sm:$0xff] (!%p2217_p1)  ;;  %v1929_v7 = vld [vmem:[%s3625_s4] sm:$0x1] (!%p2217_p1) }
 0x199   : > { %v2480_v41 = vpop.f32.mrb[14].mxu0  ;;  %v1892_v46 = vadd.f32 %v1891_v8, %v1876_v30  ;;  %v2555_v15 = vadd.f32 %v1813_v35, %v1275_v39  ;;  %v2408_v58 = vpop.f32.mrb[14].mxu1  ;;  %v2538_v8 = vpack.c.bf16 (!%p2217_p1), %v1928_v3, %v1927_v47 }
 0x19a   : > { %v1816_v63 = vpop.f32.mrb[15].mxu0  ;;  %v2556_v9 = vadd.f32 %v2480_v41, %v2408_v58  ;;  %v1278_v26 = vpop.f32.mrb[15].mxu1  ;;  %v1865_v42 = vadd.f32 %v2554_v40, %v3496_v59 }
 0x19b   : > { %v1893_v6 = vadd.f32 %v1892_v46, %v1877_v44  ;;  %v1863_v10 = vadd.f32 %v2555_v15, %v3496_v59  ;;  %v2557_v34 = vadd.f32 %v1816_v63, %v1278_v26 }
 0x19c   : > { %v1866_v4 = vadd.f32 %v2556_v9, %v3496_v59  ;;  %v1881_v49 = vmax.f32 %v1865_v42, 0.0 }
 0x19d   : > { %v1879_v38 = vmax.f32 %v1863_v10, 0.0  ;;  %v1894_v18 = vadd.f32 %v1893_v6, %v1878_v54  ;;  %v1864_v24 = vadd.f32 %v2557_v34, %v3496_v59  ;;  %v1913_v59 = vld [vmem:[%s3624_s3] sm:$0xff] (!%p2217_p1) }
 0x19e   : > { %v1882_v50 = vmax.f32 %v1866_v4, 0.0  ;;  %v2517_v25 = vpack.c.bf16 (!%p2217_p1), %v1914_v13, %v1913_v59 }
 0x19f   : > { %v1895_v23 = vadd.f32 %v1894_v18, %v1879_v38  ;;  %v1880_v19 = vmax.f32 %v1864_v24, 0.0 }
 0x1a0   : > { %2518 = vmatpush3.bf16.msra.mxu0 (!%p2217_p1), %v2517_v25 }
 0x1a1   : > { %v1896_v55 = vadd.f32 %v1895_v23, %v1880_v19  ;;  %2519 = vmatprep.subr.bf16.mxu0 (!%p2217_p1), %v2856_v48 }
 0x1a3   : > { %v1897_v52 = vadd.f32 %v1896_v55, %v1881_v49 }
 0x1a4   : > { %2521 = vmatpush3.bf16.msra.mxu0 (!%p2217_p1), %v2520_v16 }
 0x1a5   : > { %v1898_v53 = vadd.f32 %v1897_v52, %v1882_v50  ;;  %2522 = vmatprep.subr.bf16.mxu0 (!%p2217_p1), %v2856_v48 }
 0x1a7   : > { %v1899_v45 = vrot.slane %v1898_v53, 4 }
 0x1a8   : > { %2524 = vmatpush3.bf16.msra.mxu0 (!%p2217_p1), %v2523_v29 }
 0x1a9   : > { %v1900_v12 = vadd.f32 %v1899_v45, %v1898_v53  ;;  %2525 = vmatprep.subr.bf16.mxu0 (!%p2217_p1), %v2856_v48 }
 0x1ab   : > { %v1901_v56 = vrot.slane %v1900_v12, 2 }
 0x1ac   : > { %2527 = vmatpush3.bf16.msra.mxu0 (!%p2217_p1), %v2526_v33 }
 0x1ad   : > { %v1902_v61 = vadd.f32 %v1901_v56, %v1900_v12  ;;  %2528 = vmatprep.subr.bf16.mxu0 (!%p2217_p1), %v2856_v48 }
 0x1af   : > { %v1903_v62 = vrot.slane %v1902_v61, 1  ;;  %1910 = sbr.rel (%p2217_p1) target bundleno = 662 (0x296), region = 48 }
 0x1b0   : > { %2530 = vmatpush3.bf16.msra.mxu0 (!%p2217_p1), %v2529_v37 }
 0x1b1   : > { %v1904_v2 = vadd.f32 %v1903_v62, %v1902_v61  ;;  %2531 = vmatprep.subr.bf16.mxu0 (!%p2217_p1), %v2856_v48 }
 0x1b3   : > { %v1905_v31 = vadd.f32 %v1904_v2, %v1883_v0 }
 0x1b4   : > { %2533 = vmatpush3.bf16.msra.mxu0 (!%p2217_p1), %v2532_v1 }
 0x1b5   : > { %1906 = vst [vmem:[#allocation2] sm:$0x1] %v1905_v31  ;;  %2534 = vmatprep.subr.bf16.mxu0 (!%p2217_p1), %v2856_v48 }
 0x1b8   : > { %2536 = vmatpush3.bf16.msra.mxu0 %v2535_v51 }
 0x1b9   : > { %2537 = vmatprep.subr.bf16.mxu0 %v2856_v48 }
 0x1bc   : > { %v1911_v57 = vld [vmem:[#allocation2] sm:$0x1]  ;;  %2539 = vmatpush3.bf16.msra.mxu0 %v2538_v8 }
 0x1bd   : > { %v1912_v30 = vmul.f32 0.00390625, %v1911_v57 }
 0x1bf   : > { %2514 = vmatmul.mubr.f32.vlgmr.msra.gmra.mrb[0].mxu0 %v1912_v30 }
 0x292   : > { %v1996_v35 = vpop.f32.mrb[0].mxu0 }
 0x293   : > { %v1997_v40 = vadd.f32 %v1996_v35, %v1929_v7  ;;  %v2515_v39 = vpop.f32.mrb[1].mxu0 }
 0x295   : > { %2000 = vst [vmem:[%s2971_s7] sm:$0x1] %v1997_v40 }
 0x296 PF: > { %s2218_s27 = sshll.u32 %s2840_s22, 4  ;;  %s2014_s8 = sshll.u32 %s2971_s7, 4  ;;  %s2015_s8 = int_to_ptr.vmem [resolvable:$true] %s2014_s8 }
 0x297   : > { %s3571_s26 = scalar_lea.hbm %s3626_s5, %s2218_s27  ;;  %s2002_s11 = scalar_lea.sflag [#allocation4], %s237_s10 }
 0x298   : > { %s2758_s12 = scalar_lea.vmem %s2015_s8, 16  ;;  %s2859_s29 = smov [#allocation3]  }
 0x299   : > { %p2759_p2 = scmp.ne.s32.totalorder %s2015_s8, %s2758_s12  ;;  %s2762_s13 = sshll.u32 %s2859_s29, 4  ;;  %s2763_s13 = int_to_ptr.vmem [resolvable:$false] %s2762_s13 }
 0x29a   : > { %s2764_s14 = scalar_lea.vmem %s2763_s13, 32  ;;  %p2765_p6 = scmp.lt.s32.totalorder %s2015_s8, %s2763_s13 }
 0x29b   : > { %p2760_p4 = pnand %p2759_p2, %p2939_p3  ;;  %p2766_p7 = scmp.lt.s32.totalorder %s2764_s14, %s2758_s12 }
 0x29d   : > { %p2761_p5 = pneg %p2760_p4  ;;  %p2767_p8 = por %p2766_p7, %p2765_p6 }
 0x29f   : > { %p2768_p10 = pnand %p2767_p8, %p2761_p5 }
 0x2a1   : > { %2771 = shalt.err (!%p2768_p10)
}
 0x2a2   : > { %s2772_s22 = scalar_lea.hbm %s3571_s26, 16  ;;  %s2776_s21 = scalar_lea.hbm %s3626_s5, 32 }
 0x2a3   : > { %p2773_p11 = scmp.ne.s32.totalorder %s3571_s26, %s2772_s22  ;;  %p2777_p0 = scmp.lt.u32.totalorder %s3571_s26, %s3626_s5 }
 0x2a4   : > { %p2778_p1 = scmp.lt.u32.totalorder %s2776_s21, %s2772_s22  ;;  %p2780_p4 = scmp.lt.u32.totalorder %s2772_s22, %s3571_s26 }
 0x2a5   : > { %p2774_p12 = pnand %p2773_p11, %p2939_p3 }
 0x2a6   : > { %p2779_p2 = por %p2778_p1, %p2777_p0 }
 0x2a7   : > { %p2775_p13 = pneg %p2774_p12 }
 0x2a8   : > { %p2781_p5 = por %p2780_p4, %p2779_p2 }
 0x2aa   : > { %p2782_p6 = pnand %p2781_p5, %p2775_p13 }
 0x2ac   : > { %2785 = shalt.err (!%p2782_p6)
}
 0x2ad   : > { %2672 = dma.vmem_to_hbm [thread:$0]  (%p2939_p3), %s2015_s8, 16, %s3571_s26, %s2002_s11  }
 0x2ae PF: > { %p2678_p7 = scmp.ge.s32.totalorder %s2852_s25, 2  ;;  %s2026_s16 = sand.u32 1, %s2824_s18  }
 0x2af   : > { %s2027_s17 = scalar_lea.sflag [#allocation4], %s2026_s16 }
 0x2b0   : > { %p2675_p8 = pnand %p2678_p7, %p2949_p9 }
 0x2b2   : > { %2819 = dma.done.wait (!%p2675_p8), %s2027_s17, 16  }
 0x2b3   : > { %2821 = vsyncadd (!%p2675_p8), %s2027_s17, 4294967280  ;;  %s18_s25 = sadd.s32 1, %s2852_s25   ;;  %s3635_s30 = sld [smem:[#allocation6_spill]] }
 0x2b4   : > { %p15_p10 = scmp.ge.s32.totalorder %s18_s25, 6   ;;  %s3636_s18 = smov %s2828_s19 }
 0x2b5   : > { %s3637_s19 = smov %s2832_s20  ;;  %s3638_s20 = smov %s2957_s9 }
 0x2b6   : > { %s3639_s21 = smov %s2844_s23  ;;  %s3640_s22 = smov %s2848_s24 }
 0x2b7   : > { %s3641_s23 = smov %s3644_s28  ;;  %17 = sbr.rel (!%p15_p10) target bundleno = 5 (0x5), region = 91 }
 0x2b9   : > { %s3642_s24 = smov %s3635_s30 }
 0x2be   :  { %2031 = vsyncpa [#allocation4], 1 }
 0x2bf   :  { %2033 = vsyncpa [#allocation4 + $0x1], 1 }

</bundles_post_ra>
